<compile_context>
chip_gen: v6e
topology: v6e:2x2x1
jax: 0.10.0
libtpu: 0.0.40
codegen_flags: <defaults>
</compile_context>

<pallas_src>
import math

import jax
import jax.numpy as jnp
from jax.experimental import pallas as pl
from jax.experimental.pallas import tpu as pltpu

_EPS = 1e-5  # torch.nn.LayerNorm default eps


def _round_up(x, m):
    return ((x + m - 1) // m) * m


def _vmem_budget_and_limit():
    """Generation-aware VMEM budget (v5e/v6e: 128 MiB physical, v7x: 64 MiB/TC)."""
    cap = 64 * 1024 * 1024  # conservative fallback (v7x per-TensorCore figure)
    try:
        info = pltpu.get_tpu_info()
        cap = int(getattr(info, "vmem_capacity_bytes", cap)) or cap
    except Exception:
        pass
    budget = int(cap * 0.70)                              # tile-selection budget
    limit = min(int(cap * 0.85), 112 * 1024 * 1024)       # scoped limit for Mosaic
    return budget, limit


def _vmem_estimate(tm, tf, d):
    """Rough per-grid-step VMEM working set in bytes for row tile tm, d_ff tile tf."""
    act = 4 * tm * d * 4              # x in (2 bufs, f32) + out (2 bufs, f32)
    scr = 4 * tm * d + 2 * tm * d     # f32 accumulator + bf16 LN1(x) scratch
    hid = 6 * tm * tf                 # f32 hidden tile + bf16 copy for 2nd matmul
    wts = 2 * 2 * d * tf * 2          # W1 + W2 bf16 tiles, double-buffered
    par = 4 * (8 * d + 2 * 8 * tf)    # packed params + b1 tile (sublane-padded)
    return act + scr + hid + wts + par


def _tf_candidates(f):
    """Descending d_ff tile candidates (multiples of 128, or the full dim if tiny)."""
    if f <= 128:
        return [f]
    top = _round_up(f, 128)
    cands = [top]
    for t in (2048, 1024, 512, 256, 128):
        if t < top:
            cands.append(t)
    return cands


def _pick_tiles(n_rows, d, f, budget):
    """Largest row tile that fits; shrink the d_ff tile before shrinking rows."""
    tm_cap = min(512, _round_up(n_rows, 8))
    tm_cands = sorted({min(t, tm_cap) for t in (512, 256, 128, 64, 32, 16, 8)},
                      reverse=True)
    tf_cands = _tf_candidates(f)
    for tm in tm_cands:           # keep the MXU-facing row tile as large as possible
        for tf in tf_cands:       # ... and stream d_ff in smaller tiles if needed
            if _vmem_estimate(tm, tf, d) <= budget:
                return tm, tf
    # TODO(synk): working set exceeds the VMEM budget even at the smallest tiles
    # (enormous d_model); fall back and let Mosaic spill rather than failing.
    return tm_cands[-1], tf_cands[-1]


def _layernorm(x, gamma, beta):
    mean = jnp.mean(x, axis=-1, keepdims=True)
    xc = x - mean
    var = jnp.mean(xc * xc, axis=-1, keepdims=True)
    inv = jax.lax.rsqrt(var + _EPS)          # rsqrt -> EUP slot, effectively free
    return xc * inv * gamma + beta


# ------------------------------ fused FF kernel ------------------------------
# Grid: (row_tiles, d_ff_tiles).  Row axis "parallel", d_ff axis "arbitrary"
# (reduction).  packed params layout (rows of pd_ref):
#   0: LN1 gamma, 1: LN1 beta, 2: b2, 3: LN2 gamma, 4: LN2 beta, 5-7: unused.
def _feedforward_kernel(x_ref, pd_ref, b1_ref, w1_ref, w2_ref, o_ref,
                        xn_ref, acc_ref):
    j = pl.program_id(1)

    @pl.when(j == 0)
    def _init():
        x = x_ref[...].astype(jnp.float32)
        xn = _layernorm(x, pd_ref[0:1, :], pd_ref[1:2, :])
        xn_ref[...] = xn.astype(xn_ref.dtype)          # bf16 for the MXU
        acc_ref[...] = jnp.zeros_like(acc_ref)

    # ---- Linear 1 tile + GELU (MXU, bf16 operands, f32 accumulation) ----
    h = jnp.dot(xn_ref[...], w1_ref[...], preferred_element_type=jnp.float32)
    h = h + b1_ref[...].astype(jnp.float32)
    # TODO(synk): PyTorch nn.GELU() defaults to the exact erf form; the tanh
    # approximation is used for guaranteed Mosaic lowering (max ~1e-3 diff).
    h = jax.nn.gelu(h, approximate=True)
    # TODO(synk): dropout omitted — inference/eval semantics (identity).

    # ---- Linear 2 tile: accumulate partial (TM, D) contribution ----
    acc_ref[...] += jnp.dot(h.astype(w2_ref.dtype), w2_ref[...],
                            preferred_element_type=jnp.float32)

    @pl.when(j == pl.num_programs(1) - 1)
    def _finalize():
        x = x_ref[...].astype(jnp.float32)
        out = acc_ref[...] + pd_ref[2:3, :] + x        # + b2 + residual
        o_ref[...] = _layernorm(out, pd_ref[3:4, :], pd_ref[4:5, :]).astype(o_ref.dtype)


def feedforward_pallas(x2d, params_d, b1, w1, w2, *, tile_rows=None, tile_f=None):
    n, d = x2d.shape
    f = w1.shape[1]

    budget, limit = _vmem_budget_and_limit()
    tm_auto, tf_auto = _pick_tiles(n, d, f, budget)
    tm = tm_auto if tile_rows is None else tile_rows
    tf = tf_auto if tile_f is None else tile_f
    tm = min(tm, _round_up(n, 8))                      # don't over-pad tiny inputs

    n_pad = _round_up(n, tm)
    f_pad = _round_up(f, tf)
    if n_pad != n:
        # Padded rows produce harmless finite values, sliced off below.
        x2d = jnp.pad(x2d, ((0, n_pad - n), (0, 0)))
    if f_pad != f:
        # Zero-padded hidden units contribute exactly 0 (GELU(0)=0, zero W2 rows).
        w1 = jnp.pad(w1, ((0, 0), (0, f_pad - f)))
        b1 = jnp.pad(b1, ((0, 0), (0, f_pad - f)))
        w2 = jnp.pad(w2, ((0, f_pad - f), (0, 0)))

    grid = (n_pad // tm, f_pad // tf)
    cost = pl.CostEstimate(
        flops=4 * n * d * f,                            # two (N,D)x(D,F) matmuls
        transcendentals=n * f,                          # GELU tanh per hidden elem
        bytes_accessed=(2 * n * d * x2d.dtype.itemsize  # activations in + out
                        + 2 * 2 * d * f                 # bf16 W1 + W2
                        + 8 * (d + f)),                 # biases / LN params
    )

    out = pl.pallas_call(
        _feedforward_kernel,
        out_shape=jax.ShapeDtypeStruct((n_pad, d), x2d.dtype),
        grid_spec=pltpu.PrefetchScalarGridSpec(
            num_scalar_prefetch=0,
            grid=grid,
            in_specs=[
                pl.BlockSpec((tm, d), lambda i, j: (i, 0)),   # x row tile (resident over j)
                pl.BlockSpec((8, d), lambda i, j: (0, 0)),    # packed LN/bias params
                pl.BlockSpec((1, tf), lambda i, j: (0, j)),   # b1 d_ff tile
                pl.BlockSpec((d, tf), lambda i, j: (0, j)),   # W1 tile (bf16)
                pl.BlockSpec((tf, d), lambda i, j: (j, 0)),   # W2 tile (bf16)
            ],
            out_specs=pl.BlockSpec((tm, d), lambda i, j: (i, 0)),
            scratch_shapes=[
                pltpu.VMEM((tm, d), jnp.bfloat16),   # LN1(x), reused across d_ff steps
                pltpu.VMEM((tm, d), jnp.float32),    # f32 accumulator
            ],
        ),
        compiler_params=pltpu.CompilerParams(
            dimension_semantics=("parallel", "arbitrary"),   # rows shard across TCs
            vmem_limit_bytes=limit,
        ),
        cost_estimate=cost,
    )(x2d, params_d, b1, w1, w2)

    return out[:n] if n_pad != n else out


# ------------------------------- module wrapper -------------------------------
class FeedForward:
    """JAX/Pallas port of the PyTorch FeedForward module (inference forward)."""

    def __init__(self, d_model, d_ff, dropout=0.1, key=None):
        key = jax.random.PRNGKey(0) if key is None else key
        k1, k2, k3, k4 = jax.random.split(key, 4)
        gain = 1.0 / math.sqrt(2.0)
        # xavier_uniform_ with gain 1/sqrt(2); weights stored (in, out) and in
        # bf16 so they feed the MXU directly (f32 accumulation in-kernel).
        lim1 = gain * math.sqrt(6.0 / (d_model + d_ff))
        lim2 = gain * math.sqrt(6.0 / (d_ff + d_model))
        self.w1 = jax.random.uniform(k1, (d_model, d_ff), jnp.float32,
                                     -lim1, lim1).astype(jnp.bfloat16)
        self.w2 = jax.random.uniform(k2, (d_ff, d_model), jnp.float32,
                                     -lim2, lim2).astype(jnp.bfloat16)
        # nn.Linear default bias init: U(-1/sqrt(fan_in), 1/sqrt(fan_in))
        b1_lim = 1.0 / math.sqrt(d_model)
        b2_lim = 1.0 / math.sqrt(d_ff)
        self.b1 = jax.random.uniform(k3, (1, d_ff), jnp.float32, -b1_lim, b1_lim)
        self.b2 = jax.random.uniform(k4, (1, d_model), jnp.float32, -b2_lim, b2_lim)
        # LayerNorm affine defaults (weight=1, bias=0)
        self.g1 = jnp.ones((1, d_model), jnp.float32)
        self.be1 = jnp.zeros((1, d_model), jnp.float32)
        self.g2 = jnp.ones((1, d_model), jnp.float32)
        self.be2 = jnp.zeros((1, d_model), jnp.float32)
        # Pack all d_model-wide params into a single sublane-aligned (8, D) array.
        self.params_d = jnp.concatenate(
            [self.g1, self.be1, self.b2, self.g2, self.be2,
             jnp.zeros((3, d_model), jnp.float32)], axis=0)
        self.dropout_rate = dropout   # unused at inference

    def __call__(self, x, *, tile_rows=None, tile_f=None):
        b, s, d = x.shape
        x2d = x.reshape(b * s, d)
        y2d = feedforward_pallas(x2d, self.params_d, self.b1, self.w1, self.w2,
                                 tile_rows=tile_rows, tile_f=tile_f)
        return y2d.reshape(b, s, d)


# ----------------------------------- main ------------------------------------
if __name__ == "__main__":
    B, S, D, F = 2, 7, 128, 512     # lane-dense d_model; odd seq exercises row padding
    key = jax.random.PRNGKey(0)
    kx, kp = jax.random.split(key)
    x = jax.random.normal(kx, (B, S, D), dtype=jnp.float32)

    ff = FeedForward(D, F, key=kp)

    # Pure-JAX reference with identical numerics (bf16 matmul operands, f32 acc).
    def _ln_ref(v, g, b):
        m = jnp.mean(v, axis=-1, keepdims=True)
        c = v - m
        var = jnp.mean(c * c, axis=-1, keepdims=True)
        return c * jax.lax.rsqrt(var + _EPS) * g + b

    xn_ref = _ln_ref(x, ff.g1, ff.be1).astype(jnp.bfloat16)
    h_ref = jnp.dot(xn_ref, ff.w1, preferred_element_type=jnp.float32) + ff.b1
    h_ref = jax.nn.gelu(h_ref, approximate=True)
    out_ref = (jnp.dot(h_ref.astype(jnp.bfloat16), ff.w2,
                       preferred_element_type=jnp.float32) + ff.b2 + x)
    y_ref = _ln_ref(out_ref, ff.g2, ff.be2)

    configs = [
        dict(),                          # auto-sized tiles (single-step reduction here)
        dict(tile_rows=8, tile_f=256),   # multi-tile rows + 2-step d_ff reduction
        dict(tile_rows=16, tile_f=384),  # d_ff zero-padding path (512 -> 768)
    ]
    for cfg in configs:
        y = jax.block_until_ready(ff(x, **cfg))
        assert y.shape == (B, S, D)
        assert bool(jnp.all(jnp.isfinite(y)))
        err = float(jnp.max(jnp.abs(y - y_ref)))
        assert jnp.allclose(y, y_ref, atol=5e-3, rtol=5e-3), (cfg, err)

    print("KERNEL_OK")
</pallas_src>

<mosaic_0001>
module attributes {stable_mosaic.version = 11 : i64} {
  func.func @_feedforward_kernel(%arg0: i32, %arg1: i32, %arg2: memref<16x128xf32, #tpu.memory_space<vmem>>, %arg3: memref<8x128xf32, #tpu.memory_space<vmem>>, %arg4: memref<1x512xf32, #tpu.memory_space<vmem>>, %arg5: memref<128x512xbf16, #tpu.memory_space<vmem>>, %arg6: memref<512x128xbf16, #tpu.memory_space<vmem>>, %arg7: memref<16x128xf32, #tpu.memory_space<vmem>>, %arg8: memref<16x128xbf16, #tpu.memory_space<vmem>>, %arg9: memref<16x128xf32, #tpu.memory_space<vmem>>) attributes {dimension_semantics = [#tpu.dimension_semantics<parallel>, #tpu.dimension_semantics<arbitrary>], iteration_bounds = array<i64: 1, 1>, scalar_prefetch = 0 : i64, scratch_operands = 2 : i64, tpu.core_type = #tpu.core_type<tc>, window_params = [{transform_indices = @transform_0, window_bounds = array<i64: 16, 128>}, {pipeline_mode = #tpu.pipeline_mode<synchronous>, transform_indices = @transform_1, window_bounds = array<i64: 8, 128>}, {transform_indices = @transform_2, window_bounds = array<i64: 1, 512>}, {transform_indices = @transform_3, window_bounds = array<i64: 128, 512>}, {transform_indices = @transform_4, window_bounds = array<i64: 512, 128>}, {transform_indices = @transform_5, window_bounds = array<i64: 16, 128>}]} {
    %c0_i32 = arith.constant 0 : i32
    %0 = arith.cmpi eq, %arg1, %c0_i32 : i32
    %1 = arith.extui %0 : i1 to i32
    %c0_i32_0 = arith.constant 0 : i32
    %2 = arith.cmpi ne, %1, %c0_i32_0 : i32
    scf.if %2 {
      %c0_19 = arith.constant 0 : index
      %c0_20 = arith.constant 0 : index
      %31 = vector.load %arg2[%c0_19, %c0_20] : memref<16x128xf32, #tpu.memory_space<vmem>>, vector<16x128xf32>
      %c0_21 = arith.constant 0 : index
      %c0_22 = arith.constant 0 : index
      %32 = vector.load %arg3[%c0_21, %c0_22] : memref<8x128xf32, #tpu.memory_space<vmem>>, vector<1x128xf32>
      %c1 = arith.constant 1 : index
      %c0_23 = arith.constant 0 : index
      %33 = vector.load %arg3[%c1, %c0_23] : memref<8x128xf32, #tpu.memory_space<vmem>>, vector<1x128xf32>
      %cst_24 = arith.constant dense<0.000000e+00> : vector<16xf32>
      %34 = vector.multi_reduction <add>, %31, %cst_24 [1] : vector<16x128xf32> to vector<16xf32>
      %35 = vector.shape_cast %34 : vector<16xf32> to vector<16x1xf32>
      %cst_25 = arith.constant 1.280000e+02 : f32
      %36 = vector.broadcast %cst_25 : f32 to vector<16x1xf32>
      %37 = arith.divf %35, %36 : vector<16x1xf32>
      %38 = vector.broadcast %37 : vector<16x1xf32> to vector<16x128xf32>
      %39 = arith.subf %31, %38 : vector<16x128xf32>
      %40 = arith.mulf %39, %39 : vector<16x128xf32>
      %cst_26 = arith.constant dense<0.000000e+00> : vector<16xf32>
      %41 = vector.multi_reduction <add>, %40, %cst_26 [1] : vector<16x128xf32> to vector<16xf32>
      %42 = vector.shape_cast %41 : vector<16xf32> to vector<16x1xf32>
      %cst_27 = arith.constant 1.280000e+02 : f32
      %43 = vector.broadcast %cst_27 : f32 to vector<16x1xf32>
      %44 = arith.divf %42, %43 : vector<16x1xf32>
      %cst_28 = arith.constant 9.99999974E-6 : f32
      %45 = vector.broadcast %cst_28 : f32 to vector<16x1xf32>
      %46 = arith.addf %44, %45 : vector<16x1xf32>
      %47 = math.rsqrt %46 : vector<16x1xf32>
      %48 = vector.broadcast %47 : vector<16x1xf32> to vector<16x128xf32>
      %49 = arith.mulf %39, %48 : vector<16x128xf32>
      %50 = vector.broadcast %32 : vector<1x128xf32> to vector<16x128xf32>
      %51 = arith.mulf %49, %50 : vector<16x128xf32>
      %52 = vector.broadcast %33 : vector<1x128xf32> to vector<16x128xf32>
      %53 = arith.addf %51, %52 : vector<16x128xf32>
      %54 = arith.truncf %53 : vector<16x128xf32> to vector<16x128xbf16>
      %c0_29 = arith.constant 0 : index
      %c0_30 = arith.constant 0 : index
      %55 = vector.load %arg8[%c0_29, %c0_30] : memref<16x128xbf16, #tpu.memory_space<vmem>>, vector<16x128xbf16>
      tpu.vector_store %arg8[%c0_29, %c0_30], %54 {strides = array<i32>} : memref<16x128xbf16, #tpu.memory_space<vmem>>, vector<16x128xbf16>,
      %cst_31 = arith.constant 0.000000e+00 : f32
      %56 = vector.broadcast %cst_31 : f32 to vector<16x128xf32>
      %c0_32 = arith.constant 0 : index
      %c0_33 = arith.constant 0 : index
      %57 = vector.load %arg9[%c0_32, %c0_33] : memref<16x128xf32, #tpu.memory_space<vmem>>, vector<16x128xf32>
      tpu.vector_store %arg9[%c0_32, %c0_33], %56 {strides = array<i32>} : memref<16x128xf32, #tpu.memory_space<vmem>>, vector<16x128xf32>,
    } else {
    }
    %c0 = arith.constant 0 : index
    %c0_1 = arith.constant 0 : index
    %3 = vector.load %arg8[%c0, %c0_1] : memref<16x128xbf16, #tpu.memory_space<vmem>>, vector<16x128xbf16>
    %c0_2 = arith.constant 0 : index
    %c0_3 = arith.constant 0 : index
    %4 = vector.load %arg5[%c0_2, %c0_3] : memref<128x512xbf16, #tpu.memory_space<vmem>>, vector<128x512xbf16>
    %cst = arith.constant dense<0.000000e+00> : vector<16x512xf32>
    %5 = tpu.matmul %3, %4, %cst {dimension_numbers = #tpu.dot_dimension_numbers<[1], [0], [0], [1], [0, 0, 1, 1], [], []>} : vector<16x128xbf16>, vector<128x512xbf16>, vector<16x512xf32> -> vector<16x512xf32>
    %c0_4 = arith.constant 0 : index
    %c0_5 = arith.constant 0 : index
    %6 = vector.load %arg4[%c0_4, %c0_5] : memref<1x512xf32, #tpu.memory_space<vmem>>, vector<1x512xf32>
    %7 = vector.broadcast %6 : vector<1x512xf32> to vector<16x512xf32>
    %8 = arith.addf %5, %7 : vector<16x512xf32>
    %9 = arith.mulf %8, %8 : vector<16x512xf32>
    %10 = arith.mulf %8, %9 : vector<16x512xf32>
    %cst_6 = arith.constant 4.471500e-02 : f32
    %11 = vector.broadcast %cst_6 : f32 to vector<16x512xf32>
    %12 = arith.mulf %11, %10 : vector<16x512xf32>
    %13 = arith.addf %8, %12 : vector<16x512xf32>
    %cst_7 = arith.constant 0.797884583 : f32
    %14 = vector.broadcast %cst_7 : f32 to vector<16x512xf32>
    %15 = arith.mulf %14, %13 : vector<16x512xf32>
    %16 = math.tanh %15 : vector<16x512xf32>
    %cst_8 = arith.constant 1.000000e+00 : f32
    %17 = vector.broadcast %cst_8 : f32 to vector<16x512xf32>
    %18 = arith.addf %17, %16 : vector<16x512xf32>
    %cst_9 = arith.constant 5.000000e-01 : f32
    %19 = vector.broadcast %cst_9 : f32 to vector<16x512xf32>
    %20 = arith.mulf %19, %18 : vector<16x512xf32>
    %21 = arith.mulf %8, %20 : vector<16x512xf32>
    %c0_10 = arith.constant 0 : index
    %c0_11 = arith.constant 0 : index
    %22 = vector.load %arg9[%c0_10, %c0_11] : memref<16x128xf32, #tpu.memory_space<vmem>>, vector<16x128xf32>
    %23 = arith.truncf %21 : vector<16x512xf32> to vector<16x512xbf16>
    %c0_12 = arith.constant 0 : index
    %c0_13 = arith.constant 0 : index
    %24 = vector.load %arg6[%c0_12, %c0_13] : memref<512x128xbf16, #tpu.memory_space<vmem>>, vector<512x128xbf16>
    %cst_14 = arith.constant dense<0.000000e+00> : vector<16x128xf32>
    %25 = tpu.matmul %23, %24, %cst_14 {dimension_numbers = #tpu.dot_dimension_numbers<[1], [0], [0], [1], [0, 0, 1, 1], [], []>} : vector<16x512xbf16>, vector<512x128xbf16>, vector<16x128xf32> -> vector<16x128xf32>
    %26 = arith.addf %22, %25 : vector<16x128xf32>
    %c0_15 = arith.constant 0 : index
    %c0_16 = arith.constant 0 : index
    %27 = vector.load %arg9[%c0_15, %c0_16] : memref<16x128xf32, #tpu.memory_space<vmem>>, vector<16x128xf32>
    tpu.vector_store %arg9[%c0_15, %c0_16], %26 {strides = array<i32>} : memref<16x128xf32, #tpu.memory_space<vmem>>, vector<16x128xf32>,
    %c0_i32_17 = arith.constant 0 : i32
    %28 = arith.cmpi eq, %arg1, %c0_i32_17 : i32
    %29 = arith.extui %28 : i1 to i32
    %c0_i32_18 = arith.constant 0 : i32
    %30 = arith.cmpi ne, %29, %c0_i32_18 : i32
    scf.if %30 {
      %c0_19 = arith.constant 0 : index
      %c0_20 = arith.constant 0 : index
      %31 = vector.load %arg2[%c0_19, %c0_20] : memref<16x128xf32, #tpu.memory_space<vmem>>, vector<16x128xf32>
      %c0_21 = arith.constant 0 : index
      %c0_22 = arith.constant 0 : index
      %32 = vector.load %arg9[%c0_21, %c0_22] : memref<16x128xf32, #tpu.memory_space<vmem>>, vector<16x128xf32>
      %c2 = arith.constant 2 : index
      %c0_23 = arith.constant 0 : index
      %33 = vector.load %arg3[%c2, %c0_23] : memref<8x128xf32, #tpu.memory_space<vmem>>, vector<1x128xf32>
      %34 = vector.broadcast %33 : vector<1x128xf32> to vector<16x128xf32>
      %35 = arith.addf %32, %34 : vector<16x128xf32>
      %36 = arith.addf %35, %31 : vector<16x128xf32>
      %c3 = arith.constant 3 : index
      %c0_24 = arith.constant 0 : index
      %37 = vector.load %arg3[%c3, %c0_24] : memref<8x128xf32, #tpu.memory_space<vmem>>, vector<1x128xf32>
      %c4 = arith.constant 4 : index
      %c0_25 = arith.constant 0 : index
      %38 = vector.load %arg3[%c4, %c0_25] : memref<8x128xf32, #tpu.memory_space<vmem>>, vector<1x128xf32>
      %cst_26 = arith.constant dense<0.000000e+00> : vector<16xf32>
      %39 = vector.multi_reduction <add>, %36, %cst_26 [1] : vector<16x128xf32> to vector<16xf32>
      %40 = vector.shape_cast %39 : vector<16xf32> to vector<16x1xf32>
      %cst_27 = arith.constant 1.280000e+02 : f32
      %41 = vector.broadcast %cst_27 : f32 to vector<16x1xf32>
      %42 = arith.divf %40, %41 : vector<16x1xf32>
      %43 = vector.broadcast %42 : vector<16x1xf32> to vector<16x128xf32>
      %44 = arith.subf %36, %43 : vector<16x128xf32>
      %45 = arith.mulf %44, %44 : vector<16x128xf32>
      %cst_28 = arith.constant dense<0.000000e+00> : vector<16xf32>
      %46 = vector.multi_reduction <add>, %45, %cst_28 [1] : vector<16x128xf32> to vector<16xf32>
      %47 = vector.shape_cast %46 : vector<16xf32> to vector<16x1xf32>
      %cst_29 = arith.constant 1.280000e+02 : f32
      %48 = vector.broadcast %cst_29 : f32 to vector<16x1xf32>
      %49 = arith.divf %47, %48 : vector<16x1xf32>
      %cst_30 = arith.constant 9.99999974E-6 : f32
      %50 = vector.broadcast %cst_30 : f32 to vector<16x1xf32>
      %51 = arith.addf %49, %50 : vector<16x1xf32>
      %52 = math.rsqrt %51 : vector<16x1xf32>
      %53 = vector.broadcast %52 : vector<16x1xf32> to vector<16x128xf32>
      %54 = arith.mulf %44, %53 : vector<16x128xf32>
      %55 = vector.broadcast %37 : vector<1x128xf32> to vector<16x128xf32>
      %56 = arith.mulf %54, %55 : vector<16x128xf32>
      %57 = vector.broadcast %38 : vector<1x128xf32> to vector<16x128xf32>
      %58 = arith.addf %56, %57 : vector<16x128xf32>
      %c0_31 = arith.constant 0 : index
      %c0_32 = arith.constant 0 : index
      %59 = vector.load %arg7[%c0_31, %c0_32] : memref<16x128xf32, #tpu.memory_space<vmem>>, vector<16x128xf32>
      tpu.vector_store %arg7[%c0_31, %c0_32], %58 {strides = array<i32>} : memref<16x128xf32, #tpu.memory_space<vmem>>, vector<16x128xf32>,
    } else {
    }
    return
  }
  func.func @transform_0(%arg0: i32, %arg1: i32) -> (i32, i32) {
    %c0_i32 = arith.constant 0 : i32
    %c0_i32_0 = arith.constant 0 : i32
    return %arg0, %c0_i32 : i32, i32
  }
  func.func @transform_1(%arg0: i32, %arg1: i32) -> (i32, i32) {
    %c0_i32 = arith.constant 0 : i32
    %c0_i32_0 = arith.constant 0 : i32
    %c0_i32_1 = arith.constant 0 : i32
    return %c0_i32, %c0_i32_0 : i32, i32
  }
  func.func @transform_2(%arg0: i32, %arg1: i32) -> (i32, i32) {
    %c0_i32 = arith.constant 0 : i32
    %c0_i32_0 = arith.constant 0 : i32
    return %c0_i32, %arg1 : i32, i32
  }
  func.func @transform_3(%arg0: i32, %arg1: i32) -> (i32, i32) {
    %c0_i32 = arith.constant 0 : i32
    %c0_i32_0 = arith.constant 0 : i32
    return %c0_i32, %arg1 : i32, i32
  }
  func.func @transform_4(%arg0: i32, %arg1: i32) -> (i32, i32) {
    %c0_i32 = arith.constant 0 : i32
    %c0_i32_0 = arith.constant 0 : i32
    return %arg1, %c0_i32 : i32, i32
  }
  func.func @transform_5(%arg0: i32, %arg1: i32) -> (i32, i32) {
    %c0_i32 = arith.constant 0 : i32
    %c0_i32_0 = arith.constant 0 : i32
    return %arg0, %c0_i32 : i32, i32
  }
}

</mosaic_0001>

<bundles_post_ra>
// kernel: tpu_custom_call.1
= control target key start
LH: loop header
LB: loop body
LE: loop exit
PB: predicated region body
PF: predicated region fallthrough
CT: control target
= control target key end

     0   :  { %10 = vsyncpa [#allocation5], 0  ;;  %s1455_s0 = inlined_call_operand.hbm [shape: f32[16,128], index: 0, kind: input, shape index: {}]   ;;  %s1456_s1 = inlined_call_operand.hbm [shape: f32[8,128], index: 1, kind: input, shape index: {}]   ;;  %s1457_s2 = inlined_call_operand.hbm [shape: f32[1,512], index: 2, kind: input, shape index: {}]   ;;  %s1458_s3 = inlined_call_operand.hbm [shape: bf16[128,512], index: 3, kind: input, shape index: {}]   ;;  %s1459_s4 = inlined_call_operand.hbm [shape: bf16[512,128], index: 4, kind: input, shape index: {}]   ;;  %s1460_s5 = inlined_call_operand.hbm [shape: f32[16,128], index: 5, kind: output, shape index: {}]  }
   0x1   :  { %11 = vsyncpa [#allocation8], 0 }
   0x2   :  { %12 = vsyncpa [#allocation11], 0 }
   0x3   :  { %13 = vsyncpa [#allocation6], 0  ;;  %s1312_s18 = smov [#allocation7]   ;;  %s1313_s20 = smov [#allocation10]  }
   0x4   :  { %s32_s19 = sshll.u32 %s1312_s18, 4  ;;  %s51_s21 = sshll.u32 %s1313_s20, 4  ;;  %s33_s19 = int_to_ptr.vmem [resolvable:$true] %s32_s19  ;;  %s52_s21 = int_to_ptr.vmem [resolvable:$true] %s51_s21 }
   0x5   :  { %s1192_s22 = scalar_lea.vmem %s33_s19, 128  ;;  %p1197_p1 = scmp.lt.s32.totalorder %s33_s19, %s33_s19 }
   0x6   :  { %p1193_p0 = scmp.ne.s32.totalorder %s33_s19, %s1192_s22  ;;  %p1198_p2 = scmp.lt.s32.totalorder %s1192_s22, %s1192_s22 }
   0x8   :  { %p1199_p3 = por %p1198_p2, %p1197_p1 }
   0xa   :  { %p1200_p4 = pnand %p1199_p3, %p1193_p0 }
   0xc   :  { %1203 = shalt.err (!%p1200_p4)
}
   0xd   :  { %35 = dma.hbm_to_vmem [thread:$0]  %s1456_s1, 128, %s33_s19, [#allocation8]  }
   0xe   :  { %s1212_s25 = scalar_lea.vmem %s52_s21, 4096  ;;  %p1217_p6 = scmp.lt.s32.totalorder %s52_s21, %s52_s21 }
   0xf   :  { %p1213_p5 = scmp.ne.s32.totalorder %s52_s21, %s1212_s25  ;;  %p1218_p7 = scmp.lt.s32.totalorder %s1212_s25, %s1212_s25 }
  0x11   :  { %p1219_p8 = por %p1218_p7, %p1217_p6 }
  0x13   :  { %p1220_p9 = pnand %p1219_p8, %p1213_p5 }
  0x15   :  { %1223 = shalt.err (!%p1220_p9)
}
  0x16   :  { %s1314_s26 = smov 256   ;;  %s1315_s27 = smov 16  }
  0x17   :  { %57 = dma.hbm_to_vmem [thread:$0]  %s1458_s3, 4096, %s52_s21, [#allocation11], %s1314_s26, %s1314_s26, %s1315_s27  }
  0x18   :  { %s1316_s30 = smov [#allocation4]  }
  0x19   :  { %s19_s6 = sshll.u32 %s1316_s30, 4  ;;  %s20_s6 = int_to_ptr.vmem [resolvable:$true] %s19_s6 }
  0x1a   :  { %s1232_s7 = scalar_lea.vmem %s20_s6, 256  ;;  %p1237_p11 = scmp.lt.s32.totalorder %s20_s6, %s20_s6 }
  0x1b   :  { %p1233_p10 = scmp.ne.s32.totalorder %s20_s6, %s1232_s7  ;;  %p1238_p12 = scmp.lt.s32.totalorder %s1232_s7, %s1232_s7 }
  0x1d   :  { %p1239_p13 = por %p1238_p12, %p1237_p11 }
  0x1f   :  { %p1240_p0 = pnand %p1239_p13, %p1233_p10 }
  0x21   :  { %1243 = shalt.err (!%p1240_p0)
}
  0x22   :  { %s1317_s1 = smov 128   ;;  %s1318_s8 = smov 8  }
  0x23   :  { %25 = dma.hbm_to_vmem [thread:$0]  %s1455_s0, 256, %s20_s6, [#allocation5], %s1317_s1, %s1317_s1, %s1318_s8  }
  0x24   :  { %s1319_s3 = smov [#allocation9]   ;;  %s1320_s12 = smov [#allocation12]  }
  0x25   :  { %s42_s11 = sshll.u32 %s1319_s3, 4  ;;  %s63_s13 = sshll.u32 %s1320_s12, 4  ;;  %s43_s11 = int_to_ptr.vmem [resolvable:$true] %s42_s11  ;;  %s64_s13 = int_to_ptr.vmem [resolvable:$true] %s63_s13 }
  0x26   :  { %s1252_s14 = scalar_lea.vmem %s43_s11, 64  ;;  %p1257_p2 = scmp.lt.s32.totalorder %s43_s11, %s43_s11 }
  0x27   :  { %p1253_p1 = scmp.ne.s32.totalorder %s43_s11, %s1252_s14  ;;  %p1258_p3 = scmp.lt.s32.totalorder %s1252_s14, %s1252_s14 }
  0x29   :  { %p1259_p4 = por %p1258_p3, %p1257_p2 }
  0x2b   :  { %p1260_p5 = pnand %p1259_p4, %p1253_p1 }
  0x2d   :  { %1263 = shalt.err (!%p1260_p5)
}
  0x2e   :  { %45 = dma.hbm_to_vmem [thread:$0]  %s1457_s2, 64, %s43_s11, [#allocation8]  }
  0x2f   :  { %s1272_s17 = scalar_lea.vmem %s64_s13, 4096  ;;  %p1277_p7 = scmp.lt.s32.totalorder %s64_s13, %s64_s13 }
  0x30   :  { %p1273_p6 = scmp.ne.s32.totalorder %s64_s13, %s1272_s17  ;;  %p1278_p8 = scmp.lt.s32.totalorder %s1272_s17, %s1272_s17 }
  0x32   :  { %p1279_p9 = por %p1278_p8, %p1277_p7 }
  0x34   :  { %p1280_p10 = pnand %p1279_p9, %p1273_p6 }
  0x36   :  { %1283 = shalt.err (!%p1280_p10)
}
  0x37   :  { %s1321_s0 = smov 64   ;;  %s1322_s18 = smov 4  }
  0x38   :  { %69 = dma.hbm_to_vmem [thread:$0]  %s1459_s4, 4096, %s64_s13, [#allocation11], %s1321_s0, %s1321_s0, %s1322_s18  }
  0x39   :  { %1304 = dma.done.wait [#allocation5], 256  }
  0x3a   :  { %1305 = vsyncadd [#allocation5], 4294967040 }
  0x3b   :  { %1306 = dma.done.wait [#allocation8], 192  }
  0x3c   :  { %1307 = vsyncadd [#allocation8], 4294967104 }
  0x3d   :  { %1308 = dma.done.wait [#allocation11], 8192  }
  0x3e   :  { %1309 = vsyncadd [#allocation11], 4294959104  ;;  %v1373_v0 = vld [vmem:[#allocation4] sm:$0xff]  ;;  %v1375_v1 = vld [vmem:[#allocation4 + $0x8] sm:$0xff]  ;;  %v1323_v42 = vmov 0   ;;  %s1324_s2 = smov [#allocation13]  }
  0x3f   :  { %94 = vadd.xlane.f32.xlu0 %v1373_v0  ;;  %v1079_v10 = vld [vmem:[#allocation10 + $0xe4] ss:$16 sps:$4 sm:$0xff]   ;;  %v1081_v11 = vld [vmem:[#allocation10 + $0xec] ss:$16 sps:$4 sm:$0xff]   ;;  %v1083_v12 = vld [vmem:[#allocation10 + $0xe0] ss:$16 sps:$4 sm:$0xff]   ;;  %395 = vmatprep.mubr.bf16.mxu0 %v1323_v42 }
  0x40   :  { %v1084_v13 = vld [vmem:[#allocation10 + $0xe8] ss:$16 sps:$4 sm:$0xff]   ;;  %363 = vmatprep.subr.bf16.mxu0 %v1079_v10  ;;  %406 = vmatprep.subr.bf16.mxu1 %v1081_v11  ;;  %v1085_v14 = vld [vmem:[#allocation10 + $0xc4] ss:$16 sps:$4 sm:$0xff]   ;;  %v1087_v15 = vld [vmem:[#allocation10 + $0xcc] ss:$16 sps:$4 sm:$0xff]  }
  0x41   :  { %364 = vmatpush1.bf16.msra.mxu0 %v1083_v12  ;;  %407 = vmatpush1.bf16.msra.mxu1 %v1084_v13  ;;  %v1089_v16 = vld [vmem:[#allocation10 + $0xc0] ss:$16 sps:$4 sm:$0xff]   ;;  %v1090_v17 = vld [vmem:[#allocation10 + $0xc8] ss:$16 sps:$4 sm:$0xff]   ;;  %v1091_v18 = vld [vmem:[#allocation10 + $0xa4] ss:$16 sps:$4 sm:$0xff]  }
  0x42   :  { %365 = vmatprep.subr.bf16.mxu0 %v1085_v14  ;;  %408 = vmatprep.subr.bf16.mxu1 %v1087_v15  ;;  %v1093_v19 = vld [vmem:[#allocation10 + $0xac] ss:$16 sps:$4 sm:$0xff]   ;;  %v1095_v20 = vld [vmem:[#allocation10 + $0xa0] ss:$16 sps:$4 sm:$0xff]   ;;  %v1096_v21 = vld [vmem:[#allocation10 + $0xa8] ss:$16 sps:$4 sm:$0xff]  }
  0x43   :  { %96 = vadd.xlane.f32.xlu0 %v1375_v1  ;;  %v1097_v22 = vld [vmem:[#allocation10 + $0x84] ss:$16 sps:$4 sm:$0xff]   ;;  %v1099_v23 = vld [vmem:[#allocation10 + $0x8c] ss:$16 sps:$4 sm:$0xff]   ;;  %v1101_v24 = vld [vmem:[#allocation10 + $0x80] ss:$16 sps:$4 sm:$0xff]   ;;  %438 = vmatprep.mubr.bf16.mxu1 %v1323_v42 }
  0x44   :  { %v1102_v25 = vld [vmem:[#allocation10 + $0x88] ss:$16 sps:$4 sm:$0xff]   ;;  %v1103_v26 = vld [vmem:[#allocation10 + $0x64] ss:$16 sps:$4 sm:$0xff]   ;;  %v1105_v27 = vld [vmem:[#allocation10 + $0x6c] ss:$16 sps:$4 sm:$0xff]  }
  0x45   :  { %366 = vmatpush1.bf16.msra.mxu0 %v1089_v16  ;;  %409 = vmatpush1.bf16.msra.mxu1 %v1090_v17  ;;  %v1107_v28 = vld [vmem:[#allocation10 + $0x60] ss:$16 sps:$4 sm:$0xff]   ;;  %v1108_v29 = vld [vmem:[#allocation10 + $0x68] ss:$16 sps:$4 sm:$0xff]   ;;  %v1109_v30 = vld [vmem:[#allocation10 + $0x44] ss:$16 sps:$4 sm:$0xff]  }
  0x46   :  { %367 = vmatprep.subr.bf16.mxu0 %v1091_v18  ;;  %410 = vmatprep.subr.bf16.mxu1 %v1093_v19  ;;  %v1111_v31 = vld [vmem:[#allocation10 + $0x4c] ss:$16 sps:$4 sm:$0xff]   ;;  %v1113_v32 = vld [vmem:[#allocation10 + $0x40] ss:$16 sps:$4 sm:$0xff]   ;;  %v1114_v33 = vld [vmem:[#allocation10 + $0x48] ss:$16 sps:$4 sm:$0xff]  }
  0x47   :  { %v1115_v34 = vld [vmem:[#allocation10 + $0x24] ss:$16 sps:$4 sm:$0xff]   ;;  %v1117_v35 = vld [vmem:[#allocation10 + $0x2c] ss:$16 sps:$4 sm:$0xff]   ;;  %v1119_v36 = vld [vmem:[#allocation10 + $0x20] ss:$16 sps:$4 sm:$0xff]  }
  0x48   :  { %v1120_v37 = vld [vmem:[#allocation10 + $0x28] ss:$16 sps:$4 sm:$0xff]   ;;  %v1121_v38 = vld [vmem:[#allocation10 + $0x4] ss:$16 sps:$4 sm:$0xff]   ;;  %v1123_v39 = vld [vmem:[#allocation10 + $0xc] ss:$16 sps:$4 sm:$0xff]  }
  0x49   :  { %368 = vmatpush1.bf16.msra.mxu0 %v1095_v20  ;;  %411 = vmatpush1.bf16.msra.mxu1 %v1096_v21  ;;  %v1125_v40 = vld [vmem:[#allocation10] ss:$16 sps:$4 sm:$0xff]   ;;  %v1126_v41 = vld [vmem:[#allocation10 + $0x8] ss:$16 sps:$4 sm:$0xff]   ;;  %v943_v51 = vld [vmem:[#allocation7] ss:$0 sm:$0xff] }
  0x4a   :  { %369 = vmatprep.subr.bf16.mxu0 %v1097_v22  ;;  %412 = vmatprep.subr.bf16.mxu1 %v1099_v23  ;;  %v944_v55 = vld [vmem:[#allocation7 + $0x1] ss:$0 sm:$0xff]  ;;  %v1128_v61 = vld [vmem:[#allocation12 + $0x78] sm:$0xff]   ;;  %v1139_v10 = vld [vmem:[#allocation12 + $0xa8] sm:$0xff]   ;;  %s929_s4 = sshll.u32 %s1324_s2, 4  ;;  %s930_s4 = int_to_ptr.vmem [resolvable:$true] %s929_s4 }
  0x4b   :  { %v1129_v62 = vld [vmem:[#allocation12 + $0xf8] sm:$0xff]   ;;  %v1140_v11 = vld [vmem:[#allocation12 + $0x60] sm:$0xff]   ;;  %v1148_v19 = vld [vmem:[#allocation12 + $0x50] sm:$0xff]   ;;  %s1284_s21 = scalar_lea.vmem %s930_s4, 256  ;;  %p1289_p12 = scmp.lt.s32.totalorder %s930_s4, %s930_s4 }
  0x4c   :  { %v1130_v63 = vld [vmem:[#allocation12 + $0x38] sm:$0xff]   ;;  %v1141_v12 = vld [vmem:[#allocation12 + $0xe0] sm:$0xff]   ;;  %v1149_v20 = vld [vmem:[#allocation12 + $0xd0] sm:$0xff]   ;;  %p1285_p11 = scmp.ne.s32.totalorder %s930_s4, %s1284_s21  ;;  %p1290_p13 = scmp.lt.s32.totalorder %s1284_s21, %s1284_s21 }
  0x4d   :  { %370 = vmatpush1.bf16.msra.mxu0 %v1101_v24  ;;  %413 = vmatpush1.bf16.msra.mxu1 %v1102_v25  ;;  %v1142_v13 = vld [vmem:[#allocation12 + $0x20] sm:$0xff]   ;;  %v1144_v15 = vld [vmem:[#allocation12 + $0x58] sm:$0xff]   ;;  %v1150_v21 = vld [vmem:[#allocation12 + $0x10] sm:$0xff]  }
  0x4e   :  { %371 = vmatprep.subr.bf16.mxu0 %v1103_v26  ;;  %414 = vmatprep.subr.bf16.mxu1 %v1105_v27  ;;  %v1143_v14 = vld [vmem:[#allocation12 + $0xa0] sm:$0xff]   ;;  %v1145_v16 = vld [vmem:[#allocation12 + $0xd8] sm:$0xff]   ;;  %v1151_v22 = vld [vmem:[#allocation12 + $0x90] sm:$0xff]   ;;  %p1291_p0 = por %p1290_p13, %p1289_p12 }
  0x4f   :  { %v1146_v17 = vld [vmem:[#allocation12 + $0x18] sm:$0xff]   ;;  %v1152_v23 = vld [vmem:[#allocation12 + $0x48] sm:$0xff]   ;;  %v1156_v27 = vld [vmem:[#allocation12 + $0x40] sm:$0xff]  }
  0x50   :  { %v1147_v18 = vld [vmem:[#allocation12 + $0x98] sm:$0xff]   ;;  %v1153_v24 = vld [vmem:[#allocation12 + $0xc8] sm:$0xff]   ;;  %p1292_p1 = pnand %p1291_p0, %p1285_p11 }
  0x51   :  { %372 = vmatpush1.bf16.msra.mxu0 %v1107_v28  ;;  %415 = vmatpush1.bf16.msra.mxu1 %v1108_v29  ;;  %v1154_v25 = vld [vmem:[#allocation12 + $0x8] sm:$0xff]   ;;  %v1157_v28 = vld [vmem:[#allocation12 + $0xc0] sm:$0xff]  }
  0x52   :  { %373 = vmatprep.subr.bf16.mxu0 %v1109_v30  ;;  %416 = vmatprep.subr.bf16.mxu1 %v1111_v31  ;;  %v1155_v26 = vld [vmem:[#allocation12 + $0x88] sm:$0xff]   ;;  %v1158_v29 = vld [vmem:[#allocation12] sm:$0xff]   ;;  %v177_v31 = vlaneseq }
  0x53   :  { %v1159_v30 = vld [vmem:[#allocation12 + $0x80] sm:$0xff]  }
  0x55   :  { %374 = vmatpush1.bf16.msra.mxu0 %v1113_v32  ;;  %417 = vmatpush1.bf16.msra.mxu1 %v1114_v33  ;;  %v178_v32 = vshrl.u32 %v177_v31, 7 }
  0x56   :  { %375 = vmatprep.subr.bf16.mxu0 %v1115_v34  ;;  %418 = vmatprep.subr.bf16.mxu1 %v1117_v35  ;;  %v175_v35 = vld [vmem:[#allocation9] sm:$0xf] }
  0x57   :  { %v179_v33 = vsub.s32 0, %v178_v32  ;;  %v187_v34 = vsub.s32 2, %v178_v32 }
  0x59   :  { %376 = vmatpush1.bf16.msra.mxu0 %v1119_v36  ;;  %419 = vmatpush1.bf16.msra.mxu1 %v1120_v37  ;;  %v183_v36 = vsub.s32 1, %v178_v32  ;;  %v191_v37 = vsub.s32 3, %v178_v32 }
  0x5a   :  { %377 = vmatprep.subr.bf16.mxu0 %v1121_v38  ;;  %420 = vmatprep.subr.bf16.mxu1 %v1123_v39  ;;  %v180_v38 = vrot.slane %v175_v35, %v179_v33  ;;  %v188_v39 = vrot.slane %v175_v35, %v187_v34 }
  0x5d   :  { %378 = vmatpush1.bf16.msra.mxu0 %v1125_v40  ;;  %421 = vmatpush1.bf16.msra.mxu1 %v1126_v41  ;;  %v184_v40 = vrot.slane %v175_v35, %v183_v36  ;;  %v192_v41 = vrot.slane %v175_v35, %v191_v37 }
  0x5e   :  { %1022 = vmatprep.subr.bf16.mxu0 %v1128_v61  ;;  %1044 = vmatprep.subr.bf16.mxu1 %v1129_v62 }
  0xc8   :  { %v95_v2 = vpop.xlane.xlu0 %94 }
  0xc9   :  { %v99_v3 = vmul.f32 0.0078125, %v95_v2  ;;  %v1131_v2 = vld [vmem:[#allocation12 + $0xb8] sm:$0xff]  }
  0xcb   :  { %v1380_v4 = vsub.f32 %v1373_v0, %v99_v3  ;;  %v1132_v3 = vld [vmem:[#allocation12 + $0x70] sm:$0xff]  }
  0xcc   :  { %v97_v5 = vpop.xlane.xlu0 %96 }
  0xcd   :  { %v100_v6 = vmul.f32 0.0078125, %v97_v5  ;;  %v103_v7 = vmul.f32 %v1380_v4, %v1380_v4  ;;  %v1134_v5 = vld [vmem:[#allocation12 + $0x30] sm:$0xff]  }
  0xcf   :  { %v1385_v8 = vsub.f32 %v1375_v1, %v100_v6  ;;  %105 = vadd.xlane.f32.xlu1 %v103_v7  ;;  %v1135_v6 = vld [vmem:[#allocation12 + $0xb0] sm:$0xff]   ;;  %v1136_v7 = vld [vmem:[#allocation12 + $0x68] sm:$0xff]  }
  0xd1   :  { %v104_v9 = vmul.f32 %v1385_v8, %v1385_v8 }
  0xd3   :  { %107 = vadd.xlane.f32.xlu1 %v104_v9  ;;  %v1138_v9 = vld [vmem:[#allocation12 + $0x28] sm:$0xff]  }
 0x158   :  { %v106_v43 = vpop.xlane.xlu1 %105 }
 0x159   :  { %v109_v44 = vmul.f32 0.0078125, %v106_v43 }
 0x15b   :  { %v111_v45 = vadd.f32 1e-05, %v109_v44 }
 0x15c   :  { %v108_v46 = vpop.xlane.xlu1 %107 }
 0x15d   :  { %1160 = vrsqrt.f32 %v111_v45  ;;  %v110_v47 = vmul.f32 0.0078125, %v108_v46 }
 0x15f   :  { %v112_v48 = vadd.f32 1e-05, %v110_v47 }
 0x161   :  { %1162 = vrsqrt.f32 %v112_v48 }
 0x16a   :  { %v1161_v49 = vpop.eup %1160 }
 0x16b   :  { %v115_v50 = vmul.f32 %v1161_v49, %v1380_v4  ;;  %v1133_v4 = vld [vmem:[#allocation12 + $0xf0] sm:$0xff]  }
 0x16d   :  { %v121_v53 = vmul.f32 %v943_v51, %v115_v50 }
 0x16e   :  { %v1163_v52 = vpop.eup %1162 }
 0x16f   :  { %v116_v54 = vmul.f32 %v1163_v52, %v1385_v8  ;;  %v127_v57 = vadd.f32 %v944_v55, %v121_v53  ;;  %v1137_v8 = vld [vmem:[#allocation12 + $0xe8] sm:$0xff]  }
 0x171   :  { %v122_v56 = vmul.f32 %v943_v51, %v116_v54 }
 0x173   :  { %v128_v58 = vadd.f32 %v944_v55, %v122_v56 }
 0x175   :  { %v1020_v59 = vpack.c.bf16 %v128_v58, %v127_v57 }
 0x177   :  { %1021 = vst [vmem:[#allocation2] sm:$0xff] %v1020_v59  }
 0x17e   :  { %v1127_v60 = vld [vmem:[#allocation2] sm:$0xff]  }
 0x17f   :  { %396 = vmatmul.mubr.bf16.vlgmr.msra.gmra.mxu0 %v1127_v60  ;;  %439 = vmatmul.mubr.bf16.vlgmr.msra.gmra.mxu1 %v1127_v60 }
 0x180   :  { %1023 = vmatpush3.bf16.msra.mxu0 %v1130_v63  ;;  %1045 = vmatpush3.bf16.msra.mxu1 %v1131_v2 }
 0x181   :  { %1024 = vmatprep.subr.bf16.mxu0 %v1132_v3  ;;  %1046 = vmatprep.subr.bf16.mxu1 %v1133_v4 }
 0x184   :  { %1025 = vmatpush3.bf16.msra.mxu0 %v1134_v5  ;;  %1047 = vmatpush3.bf16.msra.mxu1 %v1135_v6 }
 0x185   :  { %1026 = vmatprep.subr.bf16.mxu0 %v1136_v7  ;;  %1048 = vmatprep.subr.bf16.mxu1 %v1137_v8 }
 0x188   :  { %1027 = vmatpush3.bf16.msra.mxu0 %v1138_v9  ;;  %1049 = vmatpush3.bf16.msra.mxu1 %v1139_v10 }
 0x189   :  { %1028 = vmatprep.subr.bf16.mxu0 %v1140_v11  ;;  %1050 = vmatprep.subr.bf16.mxu1 %v1141_v12 }
 0x18c   :  { %1029 = vmatpush3.bf16.msra.mxu0 %v1142_v13  ;;  %1051 = vmatpush3.bf16.msra.mxu1 %v1143_v14 }
 0x18d   :  { %1030 = vmatprep.subr.bf16.mxu0 %v1144_v15  ;;  %1052 = vmatprep.subr.bf16.mxu1 %v1145_v16 }
 0x190   :  { %1031 = vmatpush3.bf16.msra.mxu0 %v1146_v17  ;;  %1053 = vmatpush3.bf16.msra.mxu1 %v1147_v18 }
 0x191   :  { %1032 = vmatprep.subr.bf16.mxu0 %v1148_v19  ;;  %1054 = vmatprep.subr.bf16.mxu1 %v1149_v20 }
 0x194   :  { %1033 = vmatpush3.bf16.msra.mxu0 %v1150_v21  ;;  %1055 = vmatpush3.bf16.msra.mxu1 %v1151_v22 }
 0x195   :  { %1034 = vmatprep.subr.bf16.mxu0 %v1152_v23  ;;  %1056 = vmatprep.subr.bf16.mxu1 %v1153_v24 }
 0x198   :  { %1035 = vmatpush3.bf16.msra.mxu0 %v1154_v25  ;;  %1057 = vmatpush3.bf16.msra.mxu1 %v1155_v26 }
 0x199   :  { %1036 = vmatprep.subr.bf16.mxu0 %v1156_v27  ;;  %1058 = vmatprep.subr.bf16.mxu1 %v1157_v28 }
 0x19c   :  { %1037 = vmatpush3.bf16.msra.mxu0 %v1158_v29  ;;  %1059 = vmatpush3.bf16.msra.mxu1 %v1159_v30 }
 0x23f   :  { %v397_v42 = vpop.f32.mrf.mxu0  ;;  %v440_v43 = vpop.f32.mrf.mxu1 }
 0x240   :  { %v1391_v44 = vadd.f32 %v397_v42, %v180_v38  ;;  %v1393_v45 = vadd.f32 %v440_v43, %v188_v39 }
 0x241   :  { %v399_v46 = vpop.f32.mrf.mxu0  ;;  %v442_v47 = vpop.f32.mrf.mxu1 }
 0x242   :  { %v449_v48 = vmul.f32 %v1391_v44, %v1391_v44  ;;  %v451_v49 = vmul.f32 %v1393_v45, %v1393_v45  ;;  %v1399_v50 = vadd.f32 %v399_v46, %v184_v40  ;;  %v1401_v51 = vadd.f32 %v442_v47, %v192_v41 }
 0x243   :  { %v401_v52 = vpop.f32.mrf.mxu0  ;;  %v444_v53 = vpop.f32.mrf.mxu1 }
 0x244   :  { %v457_v54 = vmul.f32 %v449_v48, %v1391_v44  ;;  %v459_v55 = vmul.f32 %v451_v49, %v1393_v45  ;;  %v450_v56 = vmul.f32 %v1399_v50, %v1399_v50  ;;  %v452_v57 = vmul.f32 %v1401_v51, %v1401_v51 }
 0x245   :  { %v1409_v58 = vadd.f32 %v401_v52, %v180_v38  ;;  %v1411_v59 = vadd.f32 %v444_v53, %v188_v39  ;;  %v403_v60 = vpop.f32.mrf.mxu0  ;;  %v446_v61 = vpop.f32.mrf.mxu1 }
 0x246   :  { %v465_v62 = vmul.f32 0.044715, %v457_v54  ;;  %v467_v63 = vmul.f32 0.044715, %v459_v55  ;;  %v458_v2 = vmul.f32 %v450_v56, %v1399_v50  ;;  %v460_v3 = vmul.f32 %v452_v57, %v1401_v51 }
 0x247   :  { %v453_v4 = vmul.f32 %v1409_v58, %v1409_v58  ;;  %v455_v5 = vmul.f32 %v1411_v59, %v1411_v59  ;;  %v1419_v6 = vadd.f32 %v403_v60, %v184_v40  ;;  %v1421_v7 = vadd.f32 %v446_v61, %v192_v41 }
 0x248   :  { %v473_v8 = vadd.f32 %v465_v62, %v1391_v44  ;;  %v475_v9 = vadd.f32 %v467_v63, %v1393_v45  ;;  %v466_v10 = vmul.f32 0.044715, %v458_v2  ;;  %v468_v11 = vmul.f32 0.044715, %v460_v3 }
 0x249   :  { %v461_v12 = vmul.f32 %v453_v4, %v1409_v58  ;;  %v463_v13 = vmul.f32 %v455_v5, %v1411_v59  ;;  %v454_v14 = vmul.f32 %v1419_v6, %v1419_v6  ;;  %v456_v15 = vmul.f32 %v1421_v7, %v1421_v7 }
 0x24a   :  { %v481_v16 = vmul.f32 0.7978846, %v473_v8  ;;  %v483_v17 = vmul.f32 0.7978846, %v475_v9  ;;  %v474_v18 = vadd.f32 %v466_v10, %v1399_v50  ;;  %v476_v19 = vadd.f32 %v468_v11, %v1401_v51 }
 0x24b   :  { %v469_v20 = vmul.f32 0.044715, %v461_v12  ;;  %v471_v21 = vmul.f32 0.044715, %v463_v13  ;;  %v462_v22 = vmul.f32 %v454_v14, %v1419_v6  ;;  %v464_v23 = vmul.f32 %v456_v15, %v1421_v7 }
 0x24c   :  { %1164 = vtanh.f32 %v481_v16  ;;  %v482_v24 = vmul.f32 0.7978846, %v474_v18  ;;  %v484_v25 = vmul.f32 0.7978846, %v476_v19 }
 0x24d   :  { %1166 = vtanh.f32 %v483_v17  ;;  %v477_v26 = vadd.f32 %v469_v20, %v1409_v58  ;;  %v479_v27 = vadd.f32 %v471_v21, %v1411_v59  ;;  %v470_v28 = vmul.f32 0.044715, %v462_v22  ;;  %v1012_v20 = vld [vmem:[#allocation7 + $0x2] ss:$0 sm:$0xff] }
 0x24e   :  { %1168 = vtanh.f32 %v482_v24  ;;  %v472_v29 = vmul.f32 0.044715, %v464_v23 }
 0x24f   :  { %1170 = vtanh.f32 %v484_v25  ;;  %v485_v30 = vmul.f32 0.7978846, %v477_v26  ;;  %v487_v31 = vmul.f32 0.7978846, %v479_v27  ;;  %v478_v32 = vadd.f32 %v470_v28, %v1419_v6 }
 0x250   :  { %v480_v33 = vadd.f32 %v472_v29, %v1421_v7 }
 0x251   :  { %1172 = vtanh.f32 %v485_v30  ;;  %v486_v34 = vmul.f32 0.7978846, %v478_v32 }
 0x252   :  { %1174 = vtanh.f32 %v487_v31  ;;  %v488_v35 = vmul.f32 0.7978846, %v480_v33 }
 0x253   :  { %1176 = vtanh.f32 %v486_v34 }
 0x254   :  { %1178 = vtanh.f32 %v488_v35 }
 0x259   :  { %v1165_v36 = vpop.eup %1164 }
 0x25a   :  { %v1167_v37 = vpop.eup %1166  ;;  %v497_v42 = vadd.f32 1.0, %v1165_v36 }
 0x25b   :  { %v1169_v38 = vpop.eup %1168  ;;  %v499_v47 = vadd.f32 1.0, %v1167_v37 }
 0x25c   :  { %v1171_v39 = vpop.eup %1170  ;;  %v498_v40 = vadd.f32 1.0, %v1169_v38  ;;  %v505_v57 = vmul.f32 0.5, %v497_v42  ;;  %v1013_v42 = vld [vmem:[#allocation7 + $0x3] ss:$0 sm:$0xff] }
 0x25d   :  { %v500_v43 = vadd.f32 1.0, %v1171_v39  ;;  %v507_v63 = vmul.f32 0.5, %v499_v47 }
 0x25e   :  { %v1173_v41 = vpop.eup %1172  ;;  %v506_v56 = vmul.f32 0.5, %v498_v40  ;;  %v513_v10 = vmul.f32 %v505_v57, %v1391_v44 }
 0x25f   :  { %v1175_v46 = vpop.eup %1174  ;;  %v501_v48 = vadd.f32 1.0, %v1173_v41  ;;  %v508_v62 = vmul.f32 0.5, %v500_v43  ;;  %v515_v13 = vmul.f32 %v507_v63, %v1393_v45 }
 0x260   :  { %v1177_v49 = vpop.eup %1176  ;;  %v503_v52 = vadd.f32 1.0, %v1175_v46  ;;  %v514_v8 = vmul.f32 %v506_v56, %v1399_v50  ;;  %v1014_v46 = vld [vmem:[#allocation7 + $0x4] ss:$0 sm:$0xff] }
 0x261   :  { %v1179_v53 = vpop.eup %1178  ;;  %v509_v54 = vmul.f32 0.5, %v501_v48  ;;  %v502_v55 = vadd.f32 1.0, %v1177_v49  ;;  %v516_v11 = vmul.f32 %v508_v62, %v1401_v51 }
 0x262   :  { %v511_v60 = vmul.f32 0.5, %v503_v52  ;;  %v504_v61 = vadd.f32 1.0, %v1179_v53 }
 0x263   :  { %v510_v2 = vmul.f32 0.5, %v502_v55  ;;  %v517_v3 = vmul.f32 %v509_v54, %v1409_v58 }
 0x264   :  { %v512_v4 = vmul.f32 0.5, %v504_v61  ;;  %v519_v5 = vmul.f32 %v511_v60, %v1411_v59 }
 0x265   :  { %v518_v9 = vmul.f32 %v510_v2, %v1419_v6  ;;  %v523_v16 = vpack.c.bf16 %v517_v3, %v513_v10 }
 0x266   :  { %v520_v12 = vmul.f32 %v512_v4, %v1421_v7  ;;  %v525_v58 = vpack.c.bf16 %v519_v5, %v515_v13 }
 0x267   :  { %v524_v14 = vpack.c.bf16 %v518_v9, %v514_v8 }
 0x268   :  { %v526_v15 = vpack.c.bf16 %v520_v12, %v516_v11 }
 0x269   :  { %815 = vmatprep.mubr.bf16.mxu0 %v524_v14 }
 0x26a   :  { %856 = vmatprep.mubr.bf16.mxu1 %v526_v15  ;;  %816 = vmatmul.mubr.bf16.vlgmr.msra.gmra.mxu0 %v523_v16 }
 0x26b   :  { %857 = vmatmul.mubr.bf16.vlgmr.msra.gmra.mxu1 %v525_v58 }
 0x32a   :  { %v1038_v59 = vpop.f32.mrf.mxu0 }
 0x32b   :  { %v1060_v50 = vpop.f32.mrf.mxu1 }
 0x32c   :  { %v1039_v17 = vpop.f32.mrf.mxu0 }
 0x32d   :  { %v1040_v6 = vadd.f32 %v1039_v17, %v1038_v59  ;;  %v1061_v18 = vpop.f32.mrf.mxu1 }
 0x32e   :  { %v1062_v44 = vadd.f32 %v1061_v18, %v1060_v50  ;;  %v1041_v19 = vpop.f32.mrf.mxu0 }
 0x32f   :  { %v1063_v51 = vpop.f32.mrf.mxu1 }
 0x330   :  { %v859_v7 = vadd.f32 %v1062_v44, %v1040_v6  ;;  %v1042_v21 = vpop.f32.mrf.mxu0 }
 0x331   :  { %v1043_v45 = vadd.f32 %v1042_v21, %v1041_v19  ;;  %v1064_v22 = vpop.f32.mrf.mxu1 }
 0x332   :  { %v1065_v23 = vadd.f32 %v1064_v22, %v1063_v51  ;;  %v881_v24 = vadd.f32 %v1012_v20, %v859_v7 }
 0x334   :  { %v862_v25 = vadd.f32 %v1065_v23, %v1043_v45  ;;  %v883_v26 = vadd.f32 %v881_v24, %v1373_v0 }
 0x336   :  { %887 = vadd.xlane.f32.xlu0 %v883_v26  ;;  %v882_v27 = vadd.f32 %v1012_v20, %v862_v25 }
 0x338   :  { %v884_v28 = vadd.f32 %v882_v27, %v1375_v1 }
 0x33a   :  { %889 = vadd.xlane.f32.xlu1 %v884_v28 }
 0x3bf   :  { %v888_v29 = vpop.xlane.xlu0 %887 }
 0x3c0   :  { %v892_v30 = vmul.f32 0.0078125, %v888_v29 }
 0x3c2   :  { %v894_v31 = vsub.f32 %v883_v26, %v892_v30 }
 0x3c3   :  { %v890_v32 = vpop.xlane.xlu1 %889 }
 0x3c4   :  { %v893_v33 = vmul.f32 0.0078125, %v890_v32  ;;  %v896_v34 = vmul.f32 %v894_v31, %v894_v31 }
 0x3c6   :  { %v895_v35 = vsub.f32 %v884_v28, %v893_v33  ;;  %898 = vadd.xlane.f32.xlu0 %v896_v34 }
 0x3c8   :  { %v897_v36 = vmul.f32 %v895_v35, %v895_v35 }
 0x3ca   :  { %900 = vadd.xlane.f32.xlu1 %v897_v36 }
 0x44f   :  { %v899_v37 = vpop.xlane.xlu0 %898 }
 0x450   :  { %v902_v38 = vmul.f32 0.0078125, %v899_v37 }
 0x452   :  { %v904_v39 = vadd.f32 1e-05, %v902_v38 }
 0x453   :  { %v901_v40 = vpop.xlane.xlu1 %900 }
 0x454   :  { %1180 = vrsqrt.f32 %v904_v39  ;;  %v903_v0 = vmul.f32 0.0078125, %v901_v40 }
 0x456   :  { %v905_v41 = vadd.f32 1e-05, %v903_v0 }
 0x458   :  { %1182 = vrsqrt.f32 %v905_v41 }
 0x461   :  { %v1181_v1 = vpop.eup %1180 }
 0x462   :  { %v908_v43 = vmul.f32 %v1181_v1, %v894_v31 }
 0x464   :  { %v914_v47 = vmul.f32 %v1013_v42, %v908_v43 }
 0x465   :  { %v1183_v48 = vpop.eup %1182 }
 0x466   :  { %v909_v49 = vmul.f32 %v1183_v48, %v895_v35  ;;  %v920_v52 = vadd.f32 %v1014_v46, %v914_v47 }
 0x468   :  { %v915_v53 = vmul.f32 %v1013_v42, %v909_v49  ;;  %922 = vst [vmem:[#allocation13] sm:$0xff] %v920_v52 }
 0x46a   :  { %v921_v54 = vadd.f32 %v1014_v46, %v915_v53 }
 0x46c   :  { %923 = vst [vmem:[#allocation13 + $0x8] sm:$0xff] %v921_v54 }
 0x46d   :  { %1295 = shalt.err (!%p1292_p1)
}
 0x46e   :  { %935 = dma.vmem_to_hbm [thread:$0]  %s930_s4, 256, %s1460_s5, [#allocation6], %s1317_s1, %s1317_s1, %s1318_s8  }
 0x46f   :  { %1310 = dma.done.wait [#allocation6], 256  }
 0x470   :  { %1311 = vsyncadd [#allocation6], 4294967040 }
 0x471   :  { %939 = vsyncpa [#allocation5], 1 }
 0x472   :  { %940 = vsyncpa [#allocation8], 1 }
 0x473   :  { %941 = vsyncpa [#allocation11], 1 }
 0x474   :  { %942 = vsyncpa [#allocation6], 1 }

</bundles_post_ra>
